<compile_context>
chip_gen: v5e
topology: v5e:2x2
jax: 0.10.0
libtpu: 0.0.40
codegen_flags: <defaults>
</compile_context>

<pallas_src>
import math
from functools import partial

import jax
import jax.numpy as jnp
from jax.experimental import pallas as pl
from jax.experimental.pallas import tpu as pltpu

_VMEM_LIMIT_BYTES = 48 * 1024 * 1024  # comfortable on v5e/v6e (128 MiB), fits v7x (64 MiB)


def _round_up(n, m):
    return ((n + m - 1) // m) * m


def _pick_tile_from(n, candidates):
    """Largest candidate that evenly divides n, else the full dim."""
    for c in candidates:
        if n >= c and n % c == 0:
            return c
    return n


def _pick_head_group(n_head, head_dim):
    """Heads per grid step so G*head_dim ~ 256 lanes (full v6e/v7x MXU width)."""
    target = max(1, 256 // max(head_dim, 1))
    for g in range(min(n_head, target), 0, -1):
        if n_head % g == 0:
            return g
    return 1


def _pick_q_tile(T):
    # Two query tiles for long sequences: gives v7x's second TensorCore work at
    # B=1 and halves the live (tq, T) softmax temporaries, at the bounded cost
    # of one extra LN1 + K/V projection per layer.  Single tile otherwise.
    if T >= 1024 and T % 256 == 0:
        return T // 2
    return T


def _pad_and_tile_vocab(v, max_tile=1024):
    """(Vpad, tile): minimal 128-aligned padding, preferring large lane tiles.

    e.g. 1056 -> (1152, 384)  [was 1536 before], 10048 -> (10240, 1024),
    128 -> (128, 128).
    """
    opts = [(_round_up(v, t), t) for t in range(128, max_tile + 128, 128)]
    min_pad = min(p for p, _ in opts)
    allowed = min_pad + v // 16          # tolerate ~6% extra padding for a bigger tile
    cands = [(p, t) for p, t in opts if p <= allowed]
    vpad, tile = max(cands, key=lambda pt: (pt[1], -pt[0]))
    return vpad, tile


# ----------------------------------------------------------------------------
# In-kernel helpers (f32 math; bf16 only on matmul operands)
# ----------------------------------------------------------------------------
def _layernorm(x, w, b, eps=1e-5):
    mu = jnp.mean(x, axis=-1, keepdims=True)
    var = jnp.mean((x - mu) ** 2, axis=-1, keepdims=True)
    return (x - mu) * jax.lax.rsqrt(var + eps) * w + b


def _gelu_exact(x):
    # nn.GELU() default == exact erf-based GELU
    # TODO(synk): tanh-approx GELU would move this to the EUP slot (~1e-3 delta).
    return 0.5 * x * (1.0 + jax.lax.erf(x * (1.0 / math.sqrt(2.0))))


# ----------------------------------------------------------------------------
# Kernel 1: LN1 + non-causal attention + c_proj + residual
#   grid = (B, T//tq, n_group).  The group axis is a reduction into the output
#   block and MUST stay "arbitrary" (the out_ref read-modify-write would race
#   under megacore sharding otherwise).  hln / K / V scratches are initialized
#   at g == 0 of every (b, q-tile), so B and the q-tile axis are safely
#   "parallel".
# ----------------------------------------------------------------------------
def attn_kernel(x_ref, ln1w_ref, ln1b_ref, wqkv_ref, bqkv_ref, wpr_ref, bpr_ref,
                out_ref, hln_ref, kv_ref,
                *, scale, n_group, group, head_dim, q_tile):
    qt = pl.program_id(1)
    g = pl.program_id(2)
    row0 = pl.multiple_of(qt * q_tile, q_tile)

    @pl.when(g == 0)
    def _init():
        xb = x_ref[0]                                               # (T, C) f32
        hlb = _layernorm(xb, ln1w_ref[...], ln1b_ref[...]).astype(jnp.bfloat16)
        hln_ref[...] = hlb
        # K / V for all groups: group-major scratch, each matmul N = group*hd.
        for j in range(n_group, 3 * n_group):
            kv_ref[j - n_group] = (
                jnp.dot(hlb, wqkv_ref[j], preferred_element_type=jnp.float32)
                + bqkv_ref[j]).astype(jnp.bfloat16)
        # residual + c_proj bias for this query tile
        out_ref[0] = x_ref[0, pl.ds(row0, q_tile), :] + bpr_ref[...]

    # per-group Q projection for this query tile; 1/sqrt(hd) folded into q
    hq = hln_ref[pl.ds(row0, q_tile), :]                            # (tq, C) bf16
    q = (jnp.dot(hq, wqkv_ref[g], preferred_element_type=jnp.float32)
         + bqkv_ref[g]) * scale                                     # (tq, G*hd) f32
    q = q.astype(jnp.bfloat16)
    kg = kv_ref[g]                                                  # (T, G*hd) bf16
    vg = kv_ref[n_group + g]                                        # (T, G*hd) bf16

    ys = []
    for h in range(group):
        lo, hi = h * head_dim, (h + 1) * head_dim
        qh, kh, vh = q[:, lo:hi], kg[:, lo:hi], vg[:, lo:hi]
        # scores: contract hd of both operands (standard flash-attn lowering)
        s = jax.lax.dot_general(qh, kh, (((1,), (1,)), ((), ())),
                                preferred_element_type=jnp.float32)  # (tq, T) f32
        s = s - jnp.max(s, axis=-1, keepdims=True)
        p = jnp.exp(s)
        # approx reciprocal: ~2^-12 rel. error (fine for fine-stage logits).
        p = p * pl.reciprocal(jnp.sum(p, axis=-1, keepdims=True), approx=True)
        ys.append(jnp.dot(p.astype(jnp.bfloat16), vh,
                          preferred_element_type=jnp.float32).astype(jnp.bfloat16))
    y = jnp.concatenate(ys, axis=-1) if group > 1 else ys[0]        # (tq, G*hd)

    # accumulate this group's slice of the output projection (K = G*hd)
    out_ref[0] = out_ref[0] + jnp.dot(y, wpr_ref[g],
                                      preferred_element_type=jnp.float32)


def run_attention(x, lay, *, n_head):
    B, T, C = x.shape
    hd = C // n_head
    G = _pick_head_group(n_head, hd)
    n_group = n_head // G
    ghd = G * hd
    tq = _pick_q_tile(T)
    scale = 1.0 / math.sqrt(hd)
    return pl.pallas_call(
        partial(attn_kernel, scale=scale, n_group=n_group, group=G,
                head_dim=hd, q_tile=tq),
        out_shape=jax.ShapeDtypeStruct((B, T, C), jnp.float32),
        grid=(B, T // tq, n_group),
        in_specs=[
            pl.BlockSpec((1, T, C), lambda b, qt, g: (b, 0, 0)),            # x (residual, f32)
            pl.BlockSpec((1, C), lambda b, qt, g: (0, 0)),                  # ln1 weight
            pl.BlockSpec((1, C), lambda b, qt, g: (0, 0)),                  # ln1 bias
            pl.BlockSpec((3 * n_group, C, ghd), lambda b, qt, g: (0, 0, 0)),  # packed QKV (bf16, resident)
            pl.BlockSpec((3 * n_group, 1, ghd), lambda b, qt, g: (0, 0, 0)),  # packed QKV bias
            pl.BlockSpec((n_group, ghd, C), lambda b, qt, g: (0, 0, 0)),    # c_proj (group-major, resident)
            pl.BlockSpec((1, C), lambda b, qt, g: (0, 0)),                  # c_proj bias
        ],
        out_specs=pl.BlockSpec((1, tq, C), lambda b, qt, g: (b, qt, 0)),
        scratch_shapes=[
            pltpu.VMEM((T, C), jnp.bfloat16),                # LN1(x), full sequence
            pltpu.VMEM((2 * n_group, T, ghd), jnp.bfloat16),  # K / V, group-major
        ],
        compiler_params=pltpu.CompilerParams(
            dimension_semantics=("parallel", "parallel", "arbitrary"),
            vmem_limit_bytes=_VMEM_LIMIT_BYTES),
    )(x, lay["ln1w"], lay["ln1b"], lay["wqkv"], lay["bqkv"], lay["wpr"], lay["bpr"])


# ----------------------------------------------------------------------------
# Kernel 2: LN2 + GELU MLP + residual.  B folded into the row axis; row tiles
# are full-sequence (up to 1024 rows) so wfc/wcp are streamed as few times as
# possible; hidden axis streams weight tiles and accumulates into the output.
# ----------------------------------------------------------------------------
def mlp_kernel(x_ref, ln2w_ref, ln2b_ref, wfc_ref, bfc_ref, wcp_ref, bcp_ref,
               out_ref, hln_ref):
    @pl.when(pl.program_id(1) == 0)
    def _init():
        xb = x_ref[...]                                              # (tm, C) f32
        hln_ref[...] = _layernorm(xb, ln2w_ref[...], ln2b_ref[...]).astype(jnp.bfloat16)
        out_ref[...] = xb + bcp_ref[...]                             # residual + c_proj bias

    m = jnp.dot(hln_ref[...], wfc_ref[...],
                preferred_element_type=jnp.float32) + bfc_ref[...]   # (tm, th) f32
    m = _gelu_exact(m)
    out_ref[...] = out_ref[...] + jnp.dot(m.astype(jnp.bfloat16), wcp_ref[...],
                                          preferred_element_type=jnp.float32)


def run_mlp(x, lay):
    B, T, C = x.shape
    BT = B * T
    H = lay["wfc"].shape[1]                    # 4*C
    x2 = x.reshape(BT, C)
    tm = _pick_tile_from(BT, (1024, 512, 256))  # full-seq rows where possible
    th = _pick_tile_from(H, (512, 256, 128))    # v7x-safe; can be 1024 on v5e/v6e
    out = pl.pallas_call(
        mlp_kernel,
        out_shape=jax.ShapeDtypeStruct((BT, C), jnp.float32),
        grid=(BT // tm, H // th),
        in_specs=[
            pl.BlockSpec((tm, C), lambda m, k: (m, 0)),    # x rows (residual, f32)
            pl.BlockSpec((1, C), lambda m, k: (0, 0)),     # ln2 weight
            pl.BlockSpec((1, C), lambda m, k: (0, 0)),     # ln2 bias
            pl.BlockSpec((C, th), lambda m, k: (0, k)),    # wfc tile (bf16)
            pl.BlockSpec((1, th), lambda m, k: (0, k)),    # bfc tile
            pl.BlockSpec((th, C), lambda m, k: (k, 0)),    # wcp tile (bf16)
            pl.BlockSpec((1, C), lambda m, k: (0, 0)),     # bcp
        ],
        out_specs=pl.BlockSpec((tm, C), lambda m, k: (m, 0)),
        scratch_shapes=[pltpu.VMEM((tm, C), jnp.bfloat16)],  # LN2(x) for this row tile
        compiler_params=pltpu.CompilerParams(
            dimension_semantics=("parallel", "arbitrary"),
            vmem_limit_bytes=_VMEM_LIMIT_BYTES),
    )(x2, lay["ln2w"], lay["ln2b"], lay["wfc"], lay["bfc"], lay["wcp"], lay["bcp"])
    return out.reshape(B, T, C)


# ----------------------------------------------------------------------------
# Kernel 3: final LayerNorm + lm_head matmul.  B folded into rows; LN computed
# once per row tile into a bf16 scratch (vocab axis is "arbitrary" because of
# that scratch dependency); vocab pre-transposed + minimally 128-padded.
# ----------------------------------------------------------------------------
def head_kernel(x_ref, lnw_ref, lnb_ref, w_ref, out_ref, hln_ref):
    @pl.when(pl.program_id(1) == 0)
    def _init():
        hln_ref[...] = _layernorm(x_ref[...], lnw_ref[...], lnb_ref[...]).astype(jnp.bfloat16)
    out_ref[...] = jnp.dot(hln_ref[...], w_ref[...], preferred_element_type=jnp.float32)


def run_head(x, lnw, lnb, w_t, tv):
    B, T, C = x.shape
    BT = B * T
    Vpad = w_t.shape[1]
    x2 = x.reshape(BT, C)
    # 512-row tiles keep >=2 row tiles at T=1024 (v7x dual-TC work on the row axis).
    tm = _pick_tile_from(BT, (512, 256, 128))
    out = pl.pallas_call(
        head_kernel,
        out_shape=jax.ShapeDtypeStruct((BT, Vpad), jnp.float32),
        grid=(BT // tm, Vpad // tv),
        in_specs=[
            pl.BlockSpec((tm, C), lambda m, j: (m, 0)),
            pl.BlockSpec((1, C), lambda m, j: (0, 0)),
            pl.BlockSpec((1, C), lambda m, j: (0, 0)),
            pl.BlockSpec((C, tv), lambda m, j: (0, j)),    # lm_head tile (bf16)
        ],
        out_specs=pl.BlockSpec((tm, tv), lambda m, j: (m, j)),
        scratch_shapes=[pltpu.VMEM((tm, C), jnp.bfloat16)],  # ln_f(x) for this row tile
        compiler_params=pltpu.CompilerParams(
            dimension_semantics=("parallel", "arbitrary"),
            vmem_limit_bytes=_VMEM_LIMIT_BYTES),
    )(x2, lnw, lnb, w_t)
    return out.reshape(B, T, Vpad)


# ----------------------------------------------------------------------------
# Parameter construction (deterministic, mirrors FineGPT.__init__ shapes).
# Weights stored bf16 in kernel-friendly layouts; biases / LN params f32.
# ----------------------------------------------------------------------------
def init_params(key, *, n_layer, n_embd, n_head, input_vocab, output_vocab,
                block_size, n_codes_total, n_codes_given):
    C = n_embd
    hd = C // n_head
    G = _pick_head_group(n_head, hd)
    n_group = n_head // G
    ghd = G * hd
    std = 0.02
    n_heads_out = n_codes_total - n_codes_given
    keys = iter(jax.random.split(key, n_heads_out + n_codes_total + 1 + 12 * n_layer + 4))

    def nrm(shape):
        return std * jax.random.normal(next(keys), shape, dtype=jnp.float32)

    params = {"output_vocab": output_vocab}

    # lm_heads (V, C) bf16; wtes with weight tying wtes[i + 1] = lm_heads[i]
    lm_heads = [nrm((output_vocab, C)).astype(jnp.bfloat16) for _ in range(n_heads_out)]
    wtes = [nrm((input_vocab, C)).astype(jnp.bfloat16) for _ in range(n_codes_total)]
    for i in range(n_heads_out):
        wtes[i + 1] = lm_heads[i]
    params["wtes"] = wtes

    # pre-transposed + minimally lane-padded lm heads (C, Vpad), ONCE at init
    Vpad, tv = _pad_and_tile_vocab(output_vocab)
    params["head_tile_v"] = tv
    params["lm_heads_t"] = [
        jnp.pad(w.astype(jnp.float32).T,
                ((0, 0), (0, Vpad - output_vocab))).astype(jnp.bfloat16)
        for w in lm_heads]

    params["wpe"] = nrm((block_size, C))

    def group_major_in(w):  # (C, C) x@W layout -> (n_group, C, G*hd)
        return w.reshape(C, n_group, ghd).transpose(1, 0, 2)

    layers = []
    for _ in range(n_layer):
        wq, wk, wv = nrm((C, C)), nrm((C, C)), nrm((C, C))
        bq, bk, bv = nrm((C,)), nrm((C,)), nrm((C,))
        wpr, bpr = nrm((C, C)), nrm((C,))
        wfc, bfc = nrm((C, 4 * C)), nrm((4 * C,))
        wcp, bcp = nrm((4 * C, C)), nrm((C,))
        wqkv = jnp.concatenate(
            [group_major_in(wq), group_major_in(wk), group_major_in(wv)],
            axis=0).astype(jnp.bfloat16)                        # (3*n_group, C, G*hd)
        bqkv = jnp.concatenate(
            [bq.reshape(n_group, 1, ghd), bk.reshape(n_group, 1, ghd),
             bv.reshape(n_group, 1, ghd)], axis=0)              # (3*n_group, 1, G*hd)
        layers.append(dict(
            ln1w=jnp.ones((1, C), jnp.float32), ln1b=jnp.zeros((1, C), jnp.float32),
            wqkv=wqkv, bqkv=bqkv,
            wpr=wpr.reshape(n_group, ghd, C).astype(jnp.bfloat16),
            bpr=bpr.reshape(1, C),
            ln2w=jnp.ones((1, C), jnp.float32), ln2b=jnp.zeros((1, C), jnp.float32),
            wfc=wfc.astype(jnp.bfloat16), bfc=bfc.reshape(1, 4 * C),
            wcp=wcp.astype(jnp.bfloat16), bcp=bcp.reshape(1, C),
        ))
    params["layers"] = layers
    params["ln_f_w"] = jnp.ones((1, C), jnp.float32)
    params["ln_f_b"] = jnp.zeros((1, C), jnp.float32)
    return params


# ----------------------------------------------------------------------------
# FineGPT forward
# ----------------------------------------------------------------------------
def fine_gpt_forward(params, pred_idx, idx, *, n_head, n_codes_given):
    B, T, _ = idx.shape
    # token embeddings: sum of the first (pred_idx + 1) codebooks + position emb
    # (gathers are plain-JAX glue; dropout p = 0.0 is identity)
    x = params["wpe"][:T][None].astype(jnp.float32)
    for i in range(pred_idx + 1):
        x = x + jnp.take(params["wtes"][i], idx[:, :, i], axis=0).astype(jnp.float32)

    # TODO(synk): fuse each layer's attention+MLP into one pallas_call (or use
    # cross-call prefetch, P10) to remove the per-layer f32 residual HBM
    # round-trip between the two kernels.
    for lay in params["layers"]:
        x = run_attention(x, lay, n_head=n_head)
        x = run_mlp(x, lay)

    w_t = params["lm_heads_t"][pred_idx - n_codes_given]          # (C, Vpad) bf16
    logits = run_head(x, params["ln_f_w"], params["ln_f_b"], w_t,
                      params["head_tile_v"])
    return logits[:, :, :params["output_vocab"]]


# ----------------------------------------------------------------------------
# Pure-JAX f32 reference (same parameter values, PyTorch-equivalent math)
# ----------------------------------------------------------------------------
def fine_gpt_reference(params, pred_idx, idx, *, n_head, n_codes_given):
    B, T, _ = idx.shape
    C = params["wpe"].shape[1]
    hd = C // n_head
    f32 = jnp.float32

    def ln(x, w, b):
        mu = jnp.mean(x, -1, keepdims=True)
        var = jnp.mean((x - mu) ** 2, -1, keepdims=True)
        return (x - mu) / jnp.sqrt(var + 1e-5) * w + b

    x = params["wpe"][:T][None].astype(f32)
    for i in range(pred_idx + 1):
        x = x + jnp.take(params["wtes"][i], idx[:, :, i], axis=0).astype(f32)

    for l in params["layers"]:
        n_group = l["wpr"].shape[0]

        def full_w(wg):  # (n_group, C, G*hd) -> (C, C)
            return wg.astype(f32).transpose(1, 0, 2).reshape(C, C)

        wqkv, bqkv = l["wqkv"], l["bqkv"].astype(f32)
        wq, wk, wv = (full_w(wqkv[:n_group]), full_w(wqkv[n_group:2 * n_group]),
                      full_w(wqkv[2 * n_group:]))
        bq = bqkv[:n_group].reshape(C)
        bk = bqkv[n_group:2 * n_group].reshape(C)
        bv = bqkv[2 * n_group:].reshape(C)

        h = ln(x, l["ln1w"], l["ln1b"])
        q = (h @ wq + bq).reshape(B, T, n_head, hd).transpose(0, 2, 1, 3)
        k = (h @ wk + bk).reshape(B, T, n_head, hd).transpose(0, 2, 1, 3)
        v = (h @ wv + bv).reshape(B, T, n_head, hd).transpose(0, 2, 1, 3)
        att = jax.nn.softmax(
            jnp.einsum("bhtd,bhsd->bhts", q, k) / math.sqrt(hd), axis=-1)
        y = jnp.einsum("bhts,bhsd->bhtd", att, v)
        y = y.transpose(0, 2, 1, 3).reshape(B, T, C)
        x = x + y @ l["wpr"].astype(f32).reshape(C, C) + l["bpr"]

        h2 = ln(x, l["ln2w"], l["ln2b"])
        m = h2 @ l["wfc"].astype(f32) + l["bfc"]
        m = 0.5 * m * (1.0 + jax.lax.erf(m / math.sqrt(2.0)))
        x = x + m @ l["wcp"].astype(f32) + l["bcp"]

    x = ln(x, params["ln_f_w"], params["ln_f_b"])
    V = params["output_vocab"]
    w_t = params["lm_heads_t"][pred_idx - n_codes_given].astype(f32)[:, :V]
    return x @ w_t


# ----------------------------------------------------------------------------
if __name__ == "__main__":
    # Small synthetic config consistent with FineGPT's shapes.
    B, T = 2, 8
    n_embd, n_head, n_layer = 32, 2, 2
    input_vocab = output_vocab = 128   # equal so weight-tying is well-formed
    block_size = 16
    n_codes_total, n_codes_given = 4, 1
    pred_idx = 2

    key = jax.random.PRNGKey(0)
    pkey, ikey = jax.random.split(key)
    params = init_params(pkey, n_layer=n_layer, n_embd=n_embd, n_head=n_head,
                         input_vocab=input_vocab, output_vocab=output_vocab,
                         block_size=block_size, n_codes_total=n_codes_total,
                         n_codes_given=n_codes_given)

    idx = jax.random.randint(ikey, (B, T, n_codes_total), 0, input_vocab,
                             dtype=jnp.int32)

    logits = fine_gpt_forward(params, pred_idx, idx,
                              n_head=n_head, n_codes_given=n_codes_given)
    logits = jax.block_until_ready(logits)

    ref = fine_gpt_reference(params, pred_idx, idx,
                             n_head=n_head, n_codes_given=n_codes_given)

    assert logits.shape == (B, T, output_vocab), logits.shape
    assert bool(jnp.all(jnp.isfinite(logits)))
    max_err = float(jnp.max(jnp.abs(logits - ref)))
    assert max_err < 2e-2, max_err
    print("KERNEL_OK")
</pallas_src>

<mosaic_0001>
module attributes {stable_mosaic.version = 11 : i64} {
  func.func @attn_kernel(%arg0: i32, %arg1: i32, %arg2: i32, %arg3: memref<1x8x32xf32, #tpu.memory_space<vmem>>, %arg4: memref<1x32xf32, #tpu.memory_space<vmem>>, %arg5: memref<1x32xf32, #tpu.memory_space<vmem>>, %arg6: memref<3x32x32xbf16, #tpu.memory_space<vmem>>, %arg7: memref<3x1x32xf32, #tpu.memory_space<vmem>>, %arg8: memref<1x32x32xbf16, #tpu.memory_space<vmem>>, %arg9: memref<1x32xf32, #tpu.memory_space<vmem>>, %arg10: memref<1x8x32xf32, #tpu.memory_space<vmem>>, %arg11: memref<8x32xbf16, #tpu.memory_space<vmem>>, %arg12: memref<2x8x32xbf16, #tpu.memory_space<vmem>>) attributes {dimension_semantics = [#tpu.dimension_semantics<parallel>, #tpu.dimension_semantics<parallel>, #tpu.dimension_semantics<arbitrary>], iteration_bounds = array<i64: 2, 1, 1>, scalar_prefetch = 0 : i64, scratch_operands = 2 : i64, tpu.core_type = #tpu.core_type<tc>, window_params = [{transform_indices = @transform_0, window_bounds = array<i64: 1, 8, 32>}, {pipeline_mode = #tpu.pipeline_mode<synchronous>, transform_indices = @transform_1, window_bounds = array<i64: 1, 32>}, {pipeline_mode = #tpu.pipeline_mode<synchronous>, transform_indices = @transform_2, window_bounds = array<i64: 1, 32>}, {pipeline_mode = #tpu.pipeline_mode<synchronous>, transform_indices = @transform_3, window_bounds = array<i64: 3, 32, 32>}, {pipeline_mode = #tpu.pipeline_mode<synchronous>, transform_indices = @transform_4, window_bounds = array<i64: 3, 1, 32>}, {pipeline_mode = #tpu.pipeline_mode<synchronous>, transform_indices = @transform_5, window_bounds = array<i64: 1, 32, 32>}, {pipeline_mode = #tpu.pipeline_mode<synchronous>, transform_indices = @transform_6, window_bounds = array<i64: 1, 32>}, {transform_indices = @transform_7, window_bounds = array<i64: 1, 8, 32>}]} {
    %c8_i32 = arith.constant 8 : i32
    %0 = arith.muli %arg1, %c8_i32 : i32
    %1 = tpu.assume_multiple %0, 8 : i32
    %c0_i32 = arith.constant 0 : i32
    %2 = arith.cmpi eq, %arg2, %c0_i32 : i32
    %3 = arith.extui %2 : i1 to i32
    %c0_i32_0 = arith.constant 0 : i32
    %4 = arith.cmpi ne, %3, %c0_i32_0 : i32
    scf.if %4 {
      %c0_27 = arith.constant 0 : index
      %c0_28 = arith.constant 0 : index
      %c0_29 = arith.constant 0 : index
      %71 = vector.load %arg3[%c0_27, %c0_28, %c0_29] : memref<1x8x32xf32, #tpu.memory_space<vmem>>, vector<1x8x32xf32>
      %72 = vector.shape_cast %71 : vector<1x8x32xf32> to vector<8x32xf32>
      %c0_30 = arith.constant 0 : index
      %c0_31 = arith.constant 0 : index
      %73 = vector.load %arg4[%c0_30, %c0_31] : memref<1x32xf32, #tpu.memory_space<vmem>>, vector<1x32xf32>
      %c0_32 = arith.constant 0 : index
      %c0_33 = arith.constant 0 : index
      %74 = vector.load %arg5[%c0_32, %c0_33] : memref<1x32xf32, #tpu.memory_space<vmem>>, vector<1x32xf32>
      %cst_34 = arith.constant dense<0.000000e+00> : vector<8xf32>
      %75 = vector.multi_reduction <add>, %72, %cst_34 [1] : vector<8x32xf32> to vector<8xf32>
      %76 = vector.shape_cast %75 : vector<8xf32> to vector<8x1xf32>
      %cst_35 = arith.constant 3.200000e+01 : f32
      %77 = vector.broadcast %cst_35 : f32 to vector<8x1xf32>
      %78 = arith.divf %76, %77 : vector<8x1xf32>
      %79 = vector.broadcast %78 : vector<8x1xf32> to vector<8x32xf32>
      %80 = arith.subf %72, %79 : vector<8x32xf32>
      %81 = arith.mulf %80, %80 : vector<8x32xf32>
      %cst_36 = arith.constant dense<0.000000e+00> : vector<8xf32>
      %82 = vector.multi_reduction <add>, %81, %cst_36 [1] : vector<8x32xf32> to vector<8xf32>
      %83 = vector.shape_cast %82 : vector<8xf32> to vector<8x1xf32>
      %cst_37 = arith.constant 3.200000e+01 : f32
      %84 = vector.broadcast %cst_37 : f32 to vector<8x1xf32>
      %85 = arith.divf %83, %84 : vector<8x1xf32>
      %86 = vector.broadcast %78 : vector<8x1xf32> to vector<8x32xf32>
      %87 = arith.subf %72, %86 : vector<8x32xf32>
      %cst_38 = arith.constant 9.99999974E-6 : f32
      %88 = vector.broadcast %cst_38 : f32 to vector<8x1xf32>
      %89 = arith.addf %85, %88 : vector<8x1xf32>
      %90 = math.rsqrt %89 : vector<8x1xf32>
      %91 = vector.broadcast %90 : vector<8x1xf32> to vector<8x32xf32>
      %92 = arith.mulf %87, %91 : vector<8x32xf32>
      %93 = vector.broadcast %73 : vector<1x32xf32> to vector<8x32xf32>
      %94 = arith.mulf %92, %93 : vector<8x32xf32>
      %95 = vector.broadcast %74 : vector<1x32xf32> to vector<8x32xf32>
      %96 = arith.addf %94, %95 : vector<8x32xf32>
      %97 = arith.truncf %96 : vector<8x32xf32> to vector<8x32xbf16>
      %c0_39 = arith.constant 0 : index
      %c0_40 = arith.constant 0 : index
      %98 = vector.load %arg11[%c0_39, %c0_40] : memref<8x32xbf16, #tpu.memory_space<vmem>>, vector<8x32xbf16>
      tpu.vector_store %arg11[%c0_39, %c0_40], %97 {strides = array<i32>} : memref<8x32xbf16, #tpu.memory_space<vmem>>, vector<8x32xbf16>,
      %c1 = arith.constant 1 : index
      %c0_41 = arith.constant 0 : index
      %c0_42 = arith.constant 0 : index
      %99 = vector.load %arg6[%c1, %c0_41, %c0_42] : memref<3x32x32xbf16, #tpu.memory_space<vmem>>, vector<1x32x32xbf16>
      %100 = vector.shape_cast %99 : vector<1x32x32xbf16> to vector<32x32xbf16>
      %cst_43 = arith.constant dense<0.000000e+00> : vector<8x32xf32>
      %101 = tpu.matmul %97, %100, %cst_43 {dimension_numbers = #tpu.dot_dimension_numbers<[1], [0], [0], [1], [0, 0, 1, 1], [], []>} : vector<8x32xbf16>, vector<32x32xbf16>, vector<8x32xf32> -> vector<8x32xf32>
      %c1_44 = arith.constant 1 : index
      %c0_45 = arith.constant 0 : index
      %c0_46 = arith.constant 0 : index
      %102 = vector.load %arg7[%c1_44, %c0_45, %c0_46] : memref<3x1x32xf32, #tpu.memory_space<vmem>>, vector<1x1x32xf32>
      %103 = vector.shape_cast %102 : vector<1x1x32xf32> to vector<1x32xf32>
      %104 = vector.broadcast %103 : vector<1x32xf32> to vector<8x32xf32>
      %105 = arith.addf %101, %104 : vector<8x32xf32>
      %106 = arith.truncf %105 : vector<8x32xf32> to vector<8x32xbf16>
      %c0_47 = arith.constant 0 : index
      %c0_48 = arith.constant 0 : index
      %c0_49 = arith.constant 0 : index
      %107 = vector.load %arg12[%c0_47, %c0_48, %c0_49] : memref<2x8x32xbf16, #tpu.memory_space<vmem>>, vector<1x8x32xbf16>
      %108 = vector.shape_cast %107 : vector<1x8x32xbf16> to vector<8x32xbf16>
      %109 = vector.shape_cast %106 : vector<8x32xbf16> to vector<1x8x32xbf16>
      tpu.vector_store %arg12[%c0_47, %c0_48, %c0_49], %109 {strides = array<i32>} : memref<2x8x32xbf16, #tpu.memory_space<vmem>>, vector<1x8x32xbf16>,
      %c2 = arith.constant 2 : index
      %c0_50 = arith.constant 0 : index
      %c0_51 = arith.constant 0 : index
      %110 = vector.load %arg6[%c2, %c0_50, %c0_51] : memref<3x32x32xbf16, #tpu.memory_space<vmem>>, vector<1x32x32xbf16>
      %111 = vector.shape_cast %110 : vector<1x32x32xbf16> to vector<32x32xbf16>
      %cst_52 = arith.constant dense<0.000000e+00> : vector<8x32xf32>
      %112 = tpu.matmul %97, %111, %cst_52 {dimension_numbers = #tpu.dot_dimension_numbers<[1], [0], [0], [1], [0, 0, 1, 1], [], []>} : vector<8x32xbf16>, vector<32x32xbf16>, vector<8x32xf32> -> vector<8x32xf32>
      %c2_53 = arith.constant 2 : index
      %c0_54 = arith.constant 0 : index
      %c0_55 = arith.constant 0 : index
      %113 = vector.load %arg7[%c2_53, %c0_54, %c0_55] : memref<3x1x32xf32, #tpu.memory_space<vmem>>, vector<1x1x32xf32>
      %114 = vector.shape_cast %113 : vector<1x1x32xf32> to vector<1x32xf32>
      %115 = vector.broadcast %114 : vector<1x32xf32> to vector<8x32xf32>
      %116 = arith.addf %112, %115 : vector<8x32xf32>
      %117 = arith.truncf %116 : vector<8x32xf32> to vector<8x32xbf16>
      %c1_56 = arith.constant 1 : index
      %c0_57 = arith.constant 0 : index
      %c0_58 = arith.constant 0 : index
      %118 = vector.load %arg12[%c1_56, %c0_57, %c0_58] : memref<2x8x32xbf16, #tpu.memory_space<vmem>>, vector<1x8x32xbf16>
      %119 = vector.shape_cast %118 : vector<1x8x32xbf16> to vector<8x32xbf16>
      %120 = vector.shape_cast %117 : vector<8x32xbf16> to vector<1x8x32xbf16>
      tpu.vector_store %arg12[%c1_56, %c0_57, %c0_58], %120 {strides = array<i32>} : memref<2x8x32xbf16, #tpu.memory_space<vmem>>, vector<1x8x32xbf16>,
      %c0_59 = arith.constant 0 : index
      %121 = arith.index_cast %1 : i32 to index
      %c0_60 = arith.constant 0 : index
      %122 = vector.load %arg3[%c0_59, %121, %c0_60] : memref<1x8x32xf32, #tpu.memory_space<vmem>>, vector<1x8x32xf32>
      %123 = vector.shape_cast %122 : vector<1x8x32xf32> to vector<8x32xf32>
      %c0_61 = arith.constant 0 : index
      %c0_62 = arith.constant 0 : index
      %124 = vector.load %arg9[%c0_61, %c0_62] : memref<1x32xf32, #tpu.memory_space<vmem>>, vector<1x32xf32>
      %125 = vector.broadcast %124 : vector<1x32xf32> to vector<8x32xf32>
      %126 = arith.addf %123, %125 : vector<8x32xf32>
      %c0_63 = arith.constant 0 : index
      %c0_64 = arith.constant 0 : index
      %c0_65 = arith.constant 0 : index
      %127 = vector.load %arg10[%c0_63, %c0_64, %c0_65] : memref<1x8x32xf32, #tpu.memory_space<vmem>>, vector<1x8x32xf32>
      %128 = vector.shape_cast %127 : vector<1x8x32xf32> to vector<8x32xf32>
      %129 = vector.shape_cast %126 : vector<8x32xf32> to vector<1x8x32xf32>
      tpu.vector_store %arg10[%c0_63, %c0_64, %c0_65], %129 {strides = array<i32>} : memref<1x8x32xf32, #tpu.memory_space<vmem>>, vector<1x8x32xf32>,
    } else {
    }
    %5 = arith.index_cast %1 : i32 to index
    %c0 = arith.constant 0 : index
    %6 = vector.load %arg11[%5, %c0] : memref<8x32xbf16, #tpu.memory_space<vmem>>, vector<8x32xbf16>
    %7 = arith.index_cast %arg2 : i32 to index
    %c0_1 = arith.constant 0 : index
    %c0_2 = arith.constant 0 : index
    %8 = vector.load %arg6[%7, %c0_1, %c0_2] : memref<3x32x32xbf16, #tpu.memory_space<vmem>>, vector<1x32x32xbf16>
    %9 = vector.shape_cast %8 : vector<1x32x32xbf16> to vector<32x32xbf16>
    %cst = arith.constant dense<0.000000e+00> : vector<8x32xf32>
    %10 = tpu.matmul %6, %9, %cst {dimension_numbers = #tpu.dot_dimension_numbers<[1], [0], [0], [1], [0, 0, 1, 1], [], []>} : vector<8x32xbf16>, vector<32x32xbf16>, vector<8x32xf32> -> vector<8x32xf32>
    %11 = arith.index_cast %arg2 : i32 to index
    %c0_3 = arith.constant 0 : index
    %c0_4 = arith.constant 0 : index
    %12 = vector.load %arg7[%11, %c0_3, %c0_4] : memref<3x1x32xf32, #tpu.memory_space<vmem>>, vector<1x1x32xf32>
    %13 = vector.shape_cast %12 : vector<1x1x32xf32> to vector<1x32xf32>
    %14 = vector.broadcast %13 : vector<1x32xf32> to vector<8x32xf32>
    %15 = arith.addf %10, %14 : vector<8x32xf32>
    %cst_5 = arith.constant 2.500000e-01 : f32
    %16 = vector.broadcast %cst_5 : f32 to vector<8x32xf32>
    %17 = arith.mulf %15, %16 : vector<8x32xf32>
    %18 = arith.truncf %17 : vector<8x32xf32> to vector<8x32xbf16>
    %19 = arith.index_cast %arg2 : i32 to index
    %c0_6 = arith.constant 0 : index
    %c0_7 = arith.constant 0 : index
    %20 = vector.load %arg12[%19, %c0_6, %c0_7] : memref<2x8x32xbf16, #tpu.memory_space<vmem>>, vector<1x8x32xbf16>
    %21 = vector.shape_cast %20 : vector<1x8x32xbf16> to vector<8x32xbf16>
    %c1_i32 = arith.constant 1 : i32
    %22 = arith.addi %c1_i32, %arg2 : i32
    %23 = arith.index_cast %22 : i32 to index
    %c0_8 = arith.constant 0 : index
    %c0_9 = arith.constant 0 : index
    %24 = vector.load %arg12[%23, %c0_8, %c0_9] : memref<2x8x32xbf16, #tpu.memory_space<vmem>>, vector<1x8x32xbf16>
    %25 = vector.shape_cast %24 : vector<1x8x32xbf16> to vector<8x32xbf16>
    %26 = vector.extract_strided_slice %18 {offsets = [0, 0], sizes = [8, 16], strides = [1, 1]} : vector<8x32xbf16> to vector<8x16xbf16>
    %27 = vector.extract_strided_slice %21 {offsets = [0, 0], sizes = [8, 16], strides = [1, 1]} : vector<8x32xbf16> to vector<8x16xbf16>
    %28 = vector.extract_strided_slice %25 {offsets = [0, 0], sizes = [8, 16], strides = [1, 1]} : vector<8x32xbf16> to vector<8x16xbf16>
    %cst_10 = arith.constant dense<0.000000e+00> : vector<8x8xf32>
    %29 = tpu.matmul %26, %27, %cst_10 {dimension_numbers = #tpu.dot_dimension_numbers<[1], [1], [0], [0], [0, 0, 1, 0], [], []>} : vector<8x16xbf16>, vector<8x16xbf16>, vector<8x8xf32> -> vector<8x8xf32>
    %cst_11 = arith.constant dense<0xFF800000> : vector<8xf32>
    %30 = vector.multi_reduction <maximumf>, %29, %cst_11 [1] : vector<8x8xf32> to vector<8xf32>
    %31 = vector.shape_cast %30 : vector<8xf32> to vector<8x1xf32>
    %32 = vector.broadcast %31 : vector<8x1xf32> to vector<8x8xf32>
    %33 = arith.subf %29, %32 : vector<8x8xf32>
    %34 = math.exp %33 : vector<8x8xf32>
    %cst_12 = arith.constant dense<0.000000e+00> : vector<8xf32>
    %35 = vector.multi_reduction <add>, %34, %cst_12 [1] : vector<8x8xf32> to vector<8xf32>
    %36 = vector.shape_cast %35 : vector<8xf32> to vector<8x1xf32>
    %37 = tpu.reciprocal %36 {approx = true} : vector<8x1xf32> -> vector<8x1xf32>
    %38 = vector.broadcast %37 : vector<8x1xf32> to vector<8x8xf32>
    %39 = arith.mulf %34, %38 : vector<8x8xf32>
    %40 = arith.truncf %39 : vector<8x8xf32> to vector<8x8xbf16>
    %cst_13 = arith.constant dense<0.000000e+00> : vector<8x16xf32>
    %41 = tpu.matmul %40, %28, %cst_13 {dimension_numbers = #tpu.dot_dimension_numbers<[1], [0], [0], [1], [0, 0, 1, 1], [], []>} : vector<8x8xbf16>, vector<8x16xbf16>, vector<8x16xf32> -> vector<8x16xf32>
    %42 = arith.truncf %41 : vector<8x16xf32> to vector<8x16xbf16>
    %43 = vector.extract_strided_slice %18 {offsets = [0, 16], sizes = [8, 16], strides = [1, 1]} : vector<8x32xbf16> to vector<8x16xbf16>
    %44 = vector.extract_strided_slice %21 {offsets = [0, 16], sizes = [8, 16], strides = [1, 1]} : vector<8x32xbf16> to vector<8x16xbf16>
    %45 = vector.extract_strided_slice %25 {offsets = [0, 16], sizes = [8, 16], strides = [1, 1]} : vector<8x32xbf16> to vector<8x16xbf16>
    %cst_14 = arith.constant dense<0.000000e+00> : vector<8x8xf32>
    %46 = tpu.matmul %43, %44, %cst_14 {dimension_numbers = #tpu.dot_dimension_numbers<[1], [1], [0], [0], [0, 0, 1, 0], [], []>} : vector<8x16xbf16>, vector<8x16xbf16>, vector<8x8xf32> -> vector<8x8xf32>
    %cst_15 = arith.constant dense<0xFF800000> : vector<8xf32>
    %47 = vector.multi_reduction <maximumf>, %46, %cst_15 [1] : vector<8x8xf32> to vector<8xf32>
    %48 = vector.shape_cast %47 : vector<8xf32> to vector<8x1xf32>
    %49 = vector.broadcast %48 : vector<8x1xf32> to vector<8x8xf32>
    %50 = arith.subf %46, %49 : vector<8x8xf32>
    %51 = math.exp %50 : vector<8x8xf32>
    %cst_16 = arith.constant dense<0.000000e+00> : vector<8xf32>
    %52 = vector.multi_reduction <add>, %51, %cst_16 [1] : vector<8x8xf32> to vector<8xf32>
    %53 = vector.shape_cast %52 : vector<8xf32> to vector<8x1xf32>
    %54 = tpu.reciprocal %53 {approx = true} : vector<8x1xf32> -> vector<8x1xf32>
    %55 = vector.broadcast %54 : vector<8x1xf32> to vector<8x8xf32>
    %56 = arith.mulf %51, %55 : vector<8x8xf32>
    %57 = arith.truncf %56 : vector<8x8xf32> to vector<8x8xbf16>
    %cst_17 = arith.constant dense<0.000000e+00> : vector<8x16xf32>
    %58 = tpu.matmul %57, %45, %cst_17 {dimension_numbers = #tpu.dot_dimension_numbers<[1], [0], [0], [1], [0, 0, 1, 1], [], []>} : vector<8x8xbf16>, vector<8x16xbf16>, vector<8x16xf32> -> vector<8x16xf32>
    %59 = arith.truncf %58 : vector<8x16xf32> to vector<8x16xbf16>
    %60 = tpu.concatenate %42, %59 in 1 : vector<8x16xbf16>, vector<8x16xbf16> -> vector<8x32xbf16>
    %c0_18 = arith.constant 0 : index
    %c0_19 = arith.constant 0 : index
    %c0_20 = arith.constant 0 : index
    %61 = vector.load %arg10[%c0_18, %c0_19, %c0_20] : memref<1x8x32xf32, #tpu.memory_space<vmem>>, vector<1x8x32xf32>
    %62 = vector.shape_cast %61 : vector<1x8x32xf32> to vector<8x32xf32>
    %63 = arith.index_cast %arg2 : i32 to index
    %c0_21 = arith.constant 0 : index
    %c0_22 = arith.constant 0 : index
    %64 = vector.load %arg8[%63, %c0_21, %c0_22] : memref<1x32x32xbf16, #tpu.memory_space<vmem>>, vector<1x32x32xbf16>
    %65 = vector.shape_cast %64 : vector<1x32x32xbf16> to vector<32x32xbf16>
    %cst_23 = arith.constant dense<0.000000e+00> : vector<8x32xf32>
    %66 = tpu.matmul %60, %65, %cst_23 {dimension_numbers = #tpu.dot_dimension_numbers<[1], [0], [0], [1], [0, 0, 1, 1], [], []>} : vector<8x32xbf16>, vector<32x32xbf16>, vector<8x32xf32> -> vector<8x32xf32>
    %67 = arith.addf %62, %66 : vector<8x32xf32>
    %c0_24 = arith.constant 0 : index
    %c0_25 = arith.constant 0 : index
    %c0_26 = arith.constant 0 : index
    %68 = vector.load %arg10[%c0_24, %c0_25, %c0_26] : memref<1x8x32xf32, #tpu.memory_space<vmem>>, vector<1x8x32xf32>
    %69 = vector.shape_cast %68 : vector<1x8x32xf32> to vector<8x32xf32>
    %70 = vector.shape_cast %67 : vector<8x32xf32> to vector<1x8x32xf32>
    tpu.vector_store %arg10[%c0_24, %c0_25, %c0_26], %70 {strides = array<i32>} : memref<1x8x32xf32, #tpu.memory_space<vmem>>, vector<1x8x32xf32>,
    return
  }
  func.func @transform_0(%arg0: i32, %arg1: i32, %arg2: i32) -> (i32, i32, i32) {
    %c0_i32 = arith.constant 0 : i32
    %c0_i32_0 = arith.constant 0 : i32
    %c0_i32_1 = arith.constant 0 : i32
    return %arg0, %c0_i32, %c0_i32_0 : i32, i32, i32
  }
  func.func @transform_1(%arg0: i32, %arg1: i32, %arg2: i32) -> (i32, i32) {
    %c0_i32 = arith.constant 0 : i32
    %c0_i32_0 = arith.constant 0 : i32
    %c0_i32_1 = arith.constant 0 : i32
    return %c0_i32, %c0_i32_0 : i32, i32
  }
  func.func @transform_2(%arg0: i32, %arg1: i32, %arg2: i32) -> (i32, i32) {
    %c0_i32 = arith.constant 0 : i32
    %c0_i32_0 = arith.constant 0 : i32
    %c0_i32_1 = arith.constant 0 : i32
    return %c0_i32, %c0_i32_0 : i32, i32
  }
  func.func @transform_3(%arg0: i32, %arg1: i32, %arg2: i32) -> (i32, i32, i32) {
    %c0_i32 = arith.constant 0 : i32
    %c0_i32_0 = arith.constant 0 : i32
    %c0_i32_1 = arith.constant 0 : i32
    %c0_i32_2 = arith.constant 0 : i32
    return %c0_i32, %c0_i32_0, %c0_i32_1 : i32, i32, i32
  }
  func.func @transform_4(%arg0: i32, %arg1: i32, %arg2: i32) -> (i32, i32, i32) {
    %c0_i32 = arith.constant 0 : i32
    %c0_i32_0 = arith.constant 0 : i32
    %c0_i32_1 = arith.constant 0 : i32
    %c0_i32_2 = arith.constant 0 : i32
    return %c0_i32, %c0_i32_0, %c0_i32_1 : i32, i32, i32
  }
  func.func @transform_5(%arg0: i32, %arg1: i32, %arg2: i32) -> (i32, i32, i32) {
    %c0_i32 = arith.constant 0 : i32
    %c0_i32_0 = arith.constant 0 : i32
    %c0_i32_1 = arith.constant 0 : i32
    %c0_i32_2 = arith.constant 0 : i32
    return %c0_i32, %c0_i32_0, %c0_i32_1 : i32, i32, i32
  }
  func.func @transform_6(%arg0: i32, %arg1: i32, %arg2: i32) -> (i32, i32) {
    %c0_i32 = arith.constant 0 : i32
    %c0_i32_0 = arith.constant 0 : i32
    %c0_i32_1 = arith.constant 0 : i32
    return %c0_i32, %c0_i32_0 : i32, i32
  }
  func.func @transform_7(%arg0: i32, %arg1: i32, %arg2: i32) -> (i32, i32, i32) {
    %c0_i32 = arith.constant 0 : i32
    %c0_i32_0 = arith.constant 0 : i32
    return %arg0, %arg1, %c0_i32 : i32, i32, i32
  }
}

</mosaic_0001>

<bundles_post_ra>
// kernel: tpu_custom_call.1
= control target key start
LH: loop header
LB: loop body
LE: loop exit
PB: predicated region body
PF: predicated region fallthrough
CT: control target
= control target key end

     0   :  { %s1585_s0 = inlined_call_operand.hbm [shape: f32[2,8,32], index: 0, kind: input, shape index: {}]   ;;  %s1586_s1 = inlined_call_operand.hbm [shape: f32[1,32], index: 1, kind: input, shape index: {}]   ;;  %s1587_s2 = inlined_call_operand.hbm [shape: f32[1,32], index: 2, kind: input, shape index: {}]   ;;  %s1588_s3 = inlined_call_operand.hbm [shape: bf16[3,32,32], index: 3, kind: input, shape index: {}]   ;;  %s1589_s4 = inlined_call_operand.vmem [shape: f32[3,1,32], index: 4, kind: input, shape index: {}]   ;;  %s1590_s5 = inlined_call_operand.hbm [shape: bf16[1,32,32], index: 5, kind: input, shape index: {}]   ;;  %s1591_s6 = inlined_call_operand.vmem [shape: f32[1,32], index: 6, kind: input, shape index: {}]   ;;  %s1592_s7 = inlined_call_operand.hbm [shape: f32[2,8,32], index: 7, kind: output, shape index: {}]  }
   0x1   :  { %1593 = sst [smem:[#allocation18_spill]] %s1586_s1 }
   0x2   :  { %12 = vsyncpa [#allocation5], 0 }
   0x3   :  { %14 = vsyncpa [#allocation5 + $0x1], 0 }
   0x4   :  { %15 = vsyncpa [#allocation8], 0 }
   0x5   :  { %16 = vsyncpa [#allocation11], 0 }
   0x6   :  { %17 = vsyncpa [#allocation6], 0 }
   0x7   :  { %19 = vsyncpa [#allocation6 + $0x1], 0  ;;  %s1374_s24 = smov 0   ;;  %s1376_s25 = smov 0  }
   0x8   :  { %s1378_s26 = smov 0   ;;  %s1380_s27 = smov 0  }
   0x9   :  { %s1382_s28 = smov 0   ;;  %s1384_s29 = smov 0  }
   0xa LB: > { %s885_s30 = sadd.s32 4294967295, %s1323_s29   ;;  %p887_p0 = scmp.ge.s32.totalorder %s1323_s29, 1  ;;  %s1323_s29 = sphi %s1384_s29, %s25_s29   ;;  %s1319_s28 = sphi %s1382_s28, %s1605_s28   ;;  %s1315_s27 = sphi %s1380_s27, %s1604_s27   ;;  %s1311_s26 = sphi %s1378_s26, %s1603_s26   ;;  %s1307_s25 = sphi %s1376_s25, %s1602_s25   ;;  %s1303_s24 = sphi %s1374_s24, %s1601_s24  }
   0xb   : > { %p1408_p1 = scmp.eq.s32.totalorder %s885_s30, 0  ;;  %p229_p2 = scmp.lt.s32.totalorder %s1323_s29, 3 }
   0xc   : > { %s1595_s1 = sld [smem:[#allocation18_spill]]  ;;  %p892_p4 = scmp.ge.s32.totalorder %s1323_s29, 2 }
   0xd   : > { %p1416_p3 = pnand %p887_p0, %p229_p2  ;;  %s1325_s13 = smov [#allocation7]  }
   0xe   : > { %s243_s14 = sshll.u32 %s1325_s13, 4  ;;  %s264_s17 = sshll.u32 %s1588_s3, 4  ;;  %s244_s14 = int_to_ptr.vmem [resolvable:$true] %s243_s14  ;;  %s265_s17 = int_to_ptr.hbm [resolvable:$true] %s264_s17 }
   0xf   : > { %p977_p5 = pneg %p1416_p3  ;;  %s1326_s19 = smov [#allocation10]  }
  0x10   : > { %s266_s20 = sshll.u32 %s1326_s19, 4  ;;  %s1327_s21 = smov 64   ;;  %s267_s20 = int_to_ptr.vmem [resolvable:$true] %s266_s20 }
  0x11   : > { %p1428_p6 = pnand %p977_p5, %p1408_p1  ;;  %s1328_s22 = smov 4  }
  0x12   : > { %s241_s11 = sshll.u32 %s1595_s1, 4  ;;  %s253_s10 = sshll.u32 %s1587_s2, 4  ;;  %s242_s11 = int_to_ptr.hbm [resolvable:$true] %s241_s11  ;;  %s254_s10 = int_to_ptr.hbm [resolvable:$true] %s253_s10 }
  0x13   : > { %980 = dma.hbm_to_vmem [thread:$0]  (!%p1428_p6), %s242_s11, 16, %s244_s14, [#allocation8]  }
  0x14   : > { %986 = dma.hbm_to_vmem [thread:$0]  (!%p1428_p6), %s265_s17, 768, %s267_s20, [#allocation11], %s1327_s21, %s1327_s21, %s1328_s22  }
  0x15   : > { %s1329_s13 = smov [#allocation9]   ;;  %s281_s16 = sshll.u32 %s1590_s5, 4  ;;  %s282_s16 = int_to_ptr.hbm [resolvable:$true] %s281_s16 }
  0x16   : > { %s255_s15 = sshll.u32 %s1329_s13, 4  ;;  %s1330_s17 = smov [#allocation12]   ;;  %s256_s15 = int_to_ptr.vmem [resolvable:$true] %s255_s15 }
  0x17   : > { %983 = dma.hbm_to_vmem [thread:$0]  (!%p1428_p6), %s254_s10, 16, %s256_s15, [#allocation8]  }
  0x18   : > { %s283_s19 = sshll.u32 %s1330_s17, 4  ;;  %s44_s20 = sadd.s32 1, %s1319_s28  ;;  %s284_s19 = int_to_ptr.vmem [resolvable:$true] %s283_s19 }
  0x19   : > { %989 = dma.hbm_to_vmem [thread:$0]  (!%p1428_p6), %s282_s16, 256, %s284_s19, [#allocation11], %s1327_s21, %s1327_s21, %s1328_s22  }
  0x1a   : > { %s886_s23 = sadd.s32 4294967294, %s1323_s29   ;;  %p46_p7 = scmp.ge.s32.totalorder %s44_s20, 2 }
  0x1b   : > { %s51_s9 = sadd.s32 1, %s1311_s26  ;;  %p58_p8 = scmp.ne.s32.totalorder %s1311_s26, %s1307_s25 }
  0x1c   : > { %s1607_s20 = smov (%p46_p7, %s44_s20), 0  ;;  %p59_p9 = scmp.eq.s32.totalorder %s1323_s29, 0 }
  0x1d   : > { %p64_p10 = scmp.ne.s32.totalorder %s1307_s25, %s1303_s24  ;;  %s48_s10 = ssub.s32 %s1319_s28, %s1607_s20 }
  0x1e   : > { %p216_p11 = scmp.eq.s32.totalorder %s885_s30, 1  ;;  %p49_p12 = scmp.eq.s32.totalorder %s48_s10, 0 }
  0x1f   : > { %p1462_p13 = por %p1408_p1, %p64_p10  ;;  %p222_p2 = scmp.eq.s32.totalorder %s886_s23, 1 }
  0x20   : > { %p1466_p0 = por %p216_p11, %p58_p8  ;;  %p60_p5 = por %p59_p9, %p58_p8 }
  0x21   : > { %s1471_s22 = scalar_select %p49_p12, %s1311_s26, %s51_s9  }
  0x22   : > { %p1473_p6 = por %p222_p2, %p64_p10  ;;  %s300_s15 = sand.u32 1, %s1311_s26  }
  0x23   : > { %s894_s30 = sshll.u32 %s1319_s28, 3  ;;  %p1002_p7 = scmp.lt.s32.totalorder %s1323_s29, 2 }
  0x24   : > { %s893_s11 = sshll.u32 %s300_s15, 3  ;;  %s308_s17 = scalar_lea.hbm %s1585_s0, %s894_s30 }
  0x25   : > { %s310_s19 = sshll.u32 %s308_s17, 4  ;;  %s304_s10 = scalar_lea.vmem [#allocation4], %s893_s11  ;;  %s311_s19 = int_to_ptr.hbm [resolvable:$true] %s310_s19 }
  0x26   : > { %s312_s1 = sshll.u32 %s304_s10, 4  ;;  %p991_p11 = pnand %p1002_p7, %p60_p5  ;;  %s313_s1 = int_to_ptr.vmem [resolvable:$true] %s312_s1 }
  0x27   : > { %s301_s23 = scalar_lea.sflag [#allocation5], %s300_s15  ;;  %321 = sbr.rel (%p1416_p3) target bundleno = 1361 (0x551), region = 48 }
  0x28   : > { %993 = dma.hbm_to_vmem [thread:$0]  (!%p991_p11), %s311_s19, 128, %s313_s1, %s301_s23  }
  0x29   : > { %s1486_s9 = sand.u32 (!%p1416_p3), 1, %s1307_s25  }
  0x2a   : > { %s896_s14 = sshll.u32 (!%p1416_p3), %s1486_s9, 3  ;;  %s324_s30 = scalar_lea.sflag (!%p1416_p3), [#allocation5], %s1486_s9 }
  0x2b   : > { %s327_s11 = scalar_lea.vmem (!%p1416_p3), [#allocation4], %s896_s14 }
  0x2c   : > { %1286 = dma.done.wait (%p1462_p13), %s324_s30, 128  }
  0x2d   : > { %1288 = vsyncadd (%p1462_p13), %s324_s30, 4294967168 }
  0x2e   : > { %1290 = dma.done.wait (%p1408_p1), [#allocation8], 32  }
  0x2f   : > { %1292 = vsyncadd (%p1408_p1), [#allocation8], 4294967264 }
  0x30   : > { %1294 = dma.done.wait (%p1408_p1), [#allocation11], 1024  }
  0x31   : > { %1296 = vsyncadd (%p1408_p1), [#allocation11], 4294966272  ;;  %vm388_vm0 = vcmask 261120   ;;  %v1504_v0 = vld [vmem:[%s327_s11] sm:$0xff]  ;;  %v1331_v2 = vmov 32.0   ;;  %v951_v17 = vld [vmem:[#allocation10 + $0x20] sm:$0xff] }
  0x32   : > { %v389_v1 = vsel %vm388_vm0, %v1504_v0, 0.0  ;;  %1071 = vrcp.f32 %v1331_v2  ;;  %v950_v14 = vld [vmem:[#allocation10 + $0x18] sm:$0xff]  ;;  %v952_v15 = vld [vmem:[#allocation10 + $0x28] sm:$0xff]  ;;  %v949_v16 = vld [vmem:[#allocation10 + $0x10] sm:$0xff]  ;;  %vm427_vm5 = vcmask 257024   ;;  %vm570_vm6 = vcmask 130048  }
  0x33   : > { %390 = vadd.xlane.f32.xlu0 %v389_v1  ;;  %460 = vmatpush.bf16.msra.mxu0 %v950_v14  ;;  %v954_v18 = vld [vmem:[#allocation10 + $0x8] sm:$0xff]  ;;  %v953_v20 = vld [vmem:[#allocation10] sm:$0xff]  ;;  %v1065_v29 = vld [vmem:[#allocation7] ss:$0 sm:$0xff]  ;;  %vm606_vm7 = vcmask 1043456   ;;  %s1332_s17 = smov 112  }
  0x34   : > { %497 = vmatpush.bf16.msra.mxu1 %v952_v15  ;;  %554 = vmatpush.bf16.msra.mxu2 %v954_v18  ;;  %v1066_v32 = vld [vmem:[#allocation9] ss:$0 sm:$0xff]  ;;  %v1067_v37 = vld [vmem:[%s1589_s4 + $0x1] ss:$0 sm:$0xff]  ;;  %v1068_v38 = vld [vmem:[%s1589_s4 + $0x2] ss:$0 sm:$0xff] }
  0x35   : > { %v1069_v47 = vld [vmem:[%s1589_s4] ss:$0 sm:$0xff]  ;;  %vm590_vm8 = vcmask 64512   ;;  %s1333_s19 = smov 16   ;;  %s378_s30 = scalar_lea.vmem [#allocation13], %s896_s14 }
  0x36   : > { %s946_s11 = sshll.u32 %s1315_s27, 3  ;;  %s748_s18 = sshll.u32 %s378_s30, 4  ;;  %s749_s18 = int_to_ptr.vmem [resolvable:$true] %s748_s18 }
  0x37   : > { %461 = vmatpush.bf16.msra.mxu0 %v949_v16  ;;  %s746_s12 = scalar_lea.hbm %s1592_s7, %s946_s11  ;;  %s735_s14 = scalar_lea.sflag [#allocation6], %s1486_s9 }
  0x38   : > { %v1072_v3 = vpop.eup %1071  ;;  %498 = vmatpush.bf16.msra.mxu1 %v951_v17  ;;  %555 = vmatpush.bf16.msra.mxu2 %v953_v20  ;;  %s750_s15 = sshll.u32 %s746_s12, 4  ;;  %s1253_s10 = scalar_lea.hbm %s1592_s7, 16  ;;  %s751_s15 = int_to_ptr.hbm [resolvable:$true] %s750_s15 }
  0x39   : > { %v393_v4 = vmul.f32 32.0, %v1072_v3  ;;  %vm397_vm1 = vweird.f32 %v1072_v3  ;;  %s1247_s16 = sshra.s32 %s751_s15, 4  ;;  %s1248_s16 = int_to_ptr.hbm [resolvable:$true] %s1247_s16 }
  0x3a   : > { %p1254_p9 = scmp.lt.s32.totalorder %s1248_s16, %s1592_s7 }
  0x3b   : > { %v394_v5 = vsub.f32 1.0, %v393_v4 }
  0x3d   : > { %v395_v6 = vmul.f32 %v1072_v3, %v394_v5 }
  0x3f   : > { %v396_v7 = vadd.f32 %v1072_v3, %v395_v6 }
  0x41   : > { %v398_v8 = vsel %vm397_vm1, %v1072_v3, %v396_v7 }
  0xa6   : > { %v391_v9 = vpop.xlane.xlu0 %390 }
  0xa7   : > { %v399_v10 = vmul.f32 %v398_v8, %v391_v9 }
  0xa9   : > { %v400_v11 = vsub.f32 %v1504_v0, %v399_v10 }
  0xab   : > { %v401_v12 = vmul.f32 %v400_v11, %v400_v11 }
  0xad   : > { %v402_v13 = vsel %vm388_vm0, %v401_v12, 0.0 }
  0xae   : > { %403 = vadd.xlane.f32.xlu0 %v402_v13 }
 0x121   : > { %v404_v19 = vpop.xlane.xlu0 %403 }
 0x122   : > { %v405_v21 = vmul.f32 %v404_v19, %v398_v8 }
 0x124   : > { %v406_v22 = vadd.f32 1e-05, %v405_v21 }
 0x126   : > { %1073 = vrsqrt.f32 %v406_v22  ;;  %vm413_vm3 = vweird.f32 %v406_v22 }
 0x12c   : > { %v1074_v23 = vpop.eup %1073 }
 0x12d   : > { %v408_v24 = vmul.f32 %v1074_v23, %v406_v22  ;;  %vm414_vm2 = vweird.f32 %v1074_v23 }
 0x12e   : > { %vm415_vm4 = vmor %vm413_vm3, %vm414_vm2 }
 0x12f   : > { %v409_v25 = vmul.f32 %v1074_v23, %v408_v24 }
 0x131   : > { %v410_v26 = vmul.f32 0.5, %v409_v25 }
 0x133   : > { %v411_v27 = vsub.f32 1.5, %v410_v26 }
 0x135   : > { %v412_v28 = vmul.f32 %v1074_v23, %v411_v27 }
 0x137   : > { %v416_v30 = vsel %vm415_vm4, %v1074_v23, %v412_v28 }
 0x138   : > { %v417_v31 = vmul.f32 %v416_v30, %v400_v11  ;;  %v955_v30 = vld [vmem:[#allocation12] sm:$0xff] }
 0x13a   : > { %v421_v33 = vmul.f32 %v1065_v29, %v417_v31  ;;  %v956_v29 = vld [vmem:[#allocation12 + $0x8] sm:$0xff] }
 0x13c   : > { %v425_v34 = vadd.f32 %v1066_v32, %v421_v33 }
 0x13e   : > { %v426_v35 = vpack.c.bf16 %v425_v34, %v425_v34 }
 0x140   : > { %428 = vst.msk [vmem:[#allocation2] sm:$0xf] %vm427_vm5, %v426_v35  ;;  %911 = vmatmul.msk.bf16.vlgmr.msra.gmra.mxu0 %vm388_vm0, %v426_v35  ;;  %921 = vmatmul.msk.bf16.vlgmr.msra.gmra.mxu1 %vm388_vm0, %v426_v35 }
 0x147   : > { %v519_v36 = vld [vmem:[#allocation2] sm:$0xf] }
 0x148   : > { %930 = vmatmul.msk.bf16.vlgmr.msra.gmra.mxu2 %vm388_vm0, %v519_v36 }
 0x1bd   : > { %v463_v39 = vpop.f32.mrf.mxu0  ;;  %v500_v40 = vpop.f32.mrf.mxu1 }
 0x1be   : > { %v464_v41 = vadd.f32 %v1067_v37, %v463_v39  ;;  %v501_v42 = vadd.f32 %v1068_v38, %v500_v40  ;;  %v1070_v38 = vld [vmem:[%s1591_s6] ss:$0 sm:$0xff] }
 0x1bf   : > { %v513_v39 = vadd.f32 %v1070_v38, %v1504_v0 }
 0x1c0   : > { %v467_v43 = vpack.c.bf16 %v464_v41, %v464_v41  ;;  %v504_v44 = vpack.c.bf16 %v501_v42, %v501_v42 }
 0x1c1   : > { %514 = vst.msk [vmem:[%s378_s30] sm:$0xff] %vm388_vm0, %v513_v39 }
 0x1c2   : > { %468 = vst.msk [vmem:[#allocation3] sm:$0xf] %vm427_vm5, %v467_v43 }
 0x1c3   : > { %506 = vst.msk [vmem:[#allocation3 + $0x4] sm:$0xf] %vm427_vm5, %v504_v44 }
 0x1c5   : > { %v465_v45 = vpop.f32.mrf.mxu0  ;;  %v502_v46 = vpop.f32.mrf.mxu1 }
 0x1c8   : > { %v698_v43 = vld [vmem:[%s378_s30] sm:$0xff] }
 0x1c9   : > { %v565_v48 = vld [vmem:[#allocation3] sm:$0xf] }
 0x1ca   : > { %v575_v49 = vsel %vm570_vm6, %v565_v48, 0  ;;  %v630_v50 = vunpack.c.l.b16 %v565_v48  ;;  %v931_v51 = vld [vmem:[#allocation3 + $0x4] sm:$0xf] }
 0x1cb   : > { %v557_v52 = vpop.f32.mrf.mxu2  ;;  %584 = vmatpush.bf16.xpose.msra.mxu3 %v575_v49  ;;  %v608_v53 = vsel %vm606_vm7, %v931_v51, 0  ;;  %v666_v61 = vunpack.c.l.b16 %v931_v51 }
 0x1cc   : > { %v558_v54 = vadd.f32 %v1069_v47, %v557_v52  ;;  %617 = vmatpush.bf16.msrb.mxu0 %v608_v53  ;;  %v631_v55 = vpack.c.b16 %v630_v50, %v630_v50 }
 0x1cd   : > { %v667_v62 = vpack.c.b16 %v666_v61, %v666_v61 }
 0x1ce   : > { %v561_v56 = vmul.f32 0.25, %v558_v54  ;;  %632 = vrot.lane.b32.xlu1 %v631_v55, %s1332_s17 }
 0x1d0   : > { %v562_v57 = vpack.c.bf16 %v561_v56, %v561_v56 }
 0x1d2   : > { %v625_v58 = vunpack.c.l.b16 %v562_v57  ;;  %932 = vmatmul.msk.bf16.vlgmr.msra.gmra.mxu3 %vm570_vm6, %v562_v57 }
 0x1d3   : > { %v559_v59 = vpop.f32.mrf.mxu2  ;;  %725 = vmatpush.bf16.msrb.mxu3 %v956_v29 }
 0x1d4   : > { %v626_v60 = vpack.c.b16 %v625_v58, %v625_v58 }
 0x1d6   : > { %627 = vrot.lane.b32.xlu1 %v626_v60, %s1332_s17 }
 0x1d7   : > { %726 = vmatpush.bf16.msrb.mxu3 %v955_v30 }
 0x1de   : > { %668 = vrot.lane.b32.xlu1 %v667_v62, %s1332_s17  ;;  %s1249_s17 = scalar_lea.hbm %s1248_s16, 8 }
 0x1df   : > { %p1250_p1 = scmp.ne.s32.totalorder %s1248_s16, %s1249_s17  ;;  %p1255_p10 = scmp.lt.s32.totalorder %s1253_s10, %s1249_s17 }
 0x1e1   : > { %p1251_p3 = pnand %p1250_p1, %p1466_p0  ;;  %p1256_p12 = por %p1255_p10, %p1254_p9 }
 0x1e3   : > { %p1252_p8 = pneg %p1251_p3 }
 0x1e5   : > { %p1257_p13 = pnand %p1256_p12, %p1252_p8 }
 0x240   : > { %v633_v63 = vpop.permute.xlu1 %632 }
 0x241   : > { %v638_v1 = vsel %vm570_vm6, %v633_v63, 0 }
 0x242   : > { %647 = vmatpush.bf16.xpose.msrb.mxu1 %v638_v1 }
 0x248   : > { %v628_v2 = vpop.permute.xlu1 %627 }
 0x249   : > { %934 = vmatmul.msk.bf16.vlgmr.msrb.gmra.mxu1 %vm570_vm6, %v628_v2 }
 0x250   : > { %v669_v3 = vpop.permute.xlu1 %668 }
 0x251   : > { %v674_v4 = vsel %vm606_vm7, %v669_v3, 0 }
 0x252   : > { %683 = vmatpush.bf16.msrb.mxu2 %v674_v4 }
 0x255   : > { %v586_v5 = vpop.f32.mrf.mxu3 }
 0x256   : > { %v591_v10 = vsel %vm590_vm8, %v586_v5, -inf }
 0x25d   : > { %v588_v6 = vpop.f32.mrf.mxu3 }
 0x2c6   : > { %v649_v7 = vpop.f32.mrf.mxu1 }
 0x2c7   : > { %v653_v8 = vsel %vm590_vm8, %v649_v7, -inf }
 0x2c8   : > { %654 = vmax.xlane.f32.xlu2 %v653_v8 }
 0x2ce   : > { %v651_v9 = vpop.f32.mrf.mxu1 }
 0x2d0   : > { %592 = vmax.xlane.f32.xlu2 %v591_v10 }
 0x33b   : > { %v655_v11 = vpop.xlane.xlu2 %654 }
 0x33c   : > { %v656_v12 = vsub.f32 %v649_v7, %v655_v11 }
 0x33e   : > { %v657_v13 = vmul.f32 1.442695, %v656_v12 }
 0x340   : > { %1075 = vpow2.f32 %v657_v13 }
 0x343   : > { %v593_v14 = vpop.xlane.xlu2 %592 }
 0x344   : > { %v594_v15 = vsub.f32 %v586_v5, %v593_v14 }
 0x346   : > { %v1076_v16 = vpop.eup %1075  ;;  %v595_v17 = vmul.f32 1.442695, %v594_v15 }
 0x347   : > { %v659_v18 = vsel %vm590_vm8, %v1076_v16, 0.0 }
 0x348   : > { %1077 = vpow2.f32 %v595_v17  ;;  %660 = vadd.xlane.f32.xlu0 %v659_v18 }
 0x34e   : > { %v1078_v19 = vpop.eup %1077 }
 0x34f   : > { %v597_v20 = vsel %vm590_vm8, %v1078_v19, 0.0 }
 0x350   : > { %598 = vadd.xlane.f32.xlu2 %v597_v20 }
 0x3bb   : > { %v661_v21 = vpop.xlane.xlu0 %660 }
 0x3bc   : > { %1079 = vrcp.f32 %v661_v21 }
 0x3c2   : > { %v1080_v22 = vpop.eup %1079 }
 0x3c3   : > { %v663_v23 = vmul.f32 %v1080_v22, %v1076_v16  ;;  %v599_v24 = vpop.xlane.xlu2 %598 }
 0x3c4   : > { %1081 = vrcp.f32 %v599_v24 }
 0x3c5   : > { %v664_v25 = vpack.c.bf16 %v663_v23, %v663_v23 }
 0x3c7   : > { %935 = vmatmul.msk.bf16.vlgmr.msrb.gmra.mxu2 %vm590_vm8, %v664_v25 }
 0x3ca   : > { %v1082_v26 = vpop.eup %1081 }
 0x3cb   : > { %v601_v27 = vmul.f32 %v1082_v26, %v1078_v19 }
 0x3cd   : > { %v602_v28 = vpack.c.bf16 %v601_v27, %v601_v27 }
 0x3cf   : > { %933 = vmatmul.msk.bf16.vlgmr.msrb.gmra.mxu0 %vm590_vm8, %v602_v28 }
 0x44a   : > { %v685_v31 = vpop.f32.mrf.mxu2 }
 0x44b   : > { %v689_v32 = vpack.c.bf16 %v685_v31, %v685_v31 }
 0x44c   : > { %v619_v33 = vpop.f32.mrf.mxu0 }
 0x44d   : > { %v691_v34 = vunpack.c.l.b16 %v689_v32  ;;  %v623_v40 = vpack.c.bf16 %v619_v33, %v619_v33 }
 0x44f   : > { %v692_v35 = vpack.c.b16 %v691_v34, %v691_v34 }
 0x451   : > { %693 = vrot.lane.b32.xlu0 %v692_v35, %s1333_s19 }
 0x452   : > { %v687_v36 = vpop.f32.mrf.mxu2 }
 0x454   : > { %v621_v37 = vpop.f32.mrf.mxu0 }
 0x4c3   : > { %v694_v41 = vpop.permute.xlu0 %693 }
 0x4c4   : > { %v697_v42 = vsel %vm570_vm6, %v623_v40, %v694_v41 }
 0x4c5   : > { %944 = vmatmul.msk.bf16.vlgmr.msrb.gmra.mxu3 %vm388_vm0, %v697_v42 }
 0x548   : > { %v728_v0 = vpop.f32.mrf.mxu3 }
 0x549   : > { %v732_v44 = vadd.f32 %v728_v0, %v698_v43 }
 0x54b   : > { %733 = vst.msk [vmem:[%s378_s30] sm:$0xff] %vm388_vm0, %v732_v44 }
 0x54c   : > { %1260 = shalt.err (!%p1257_p13)
}
 0x54d   : > { %975 = dma.vmem_to_hbm [thread:$0]  (%p1466_p0), %s749_s18, 128, %s751_s15, %s735_s14  }
 0x550   : > { %v730_v45 = vpop.f32.mrf.mxu3 }
 0x551 PF: > { %s762_s9 = sand.u32 1, %s1303_s24   ;;  %p995_p2 = pnand %p892_p4, %p1473_p6 }
 0x552   : > { %s763_s30 = scalar_lea.sflag [#allocation6], %s762_s9 }
 0x553   : > { %p996_p5 = pneg %p995_p2 }
 0x555   : > { %1298 = dma.done.wait (%p996_p5), %s763_s30, 128  }
 0x556   : > { %1300 = vsyncadd (%p996_p5), %s763_s30, 4294967168  ;;  %s25_s29 = sadd.s32 1, %s1323_s29   ;;  %s1601_s24 = smov %s1307_s25 }
 0x557   : > { %p22_p7 = scmp.ge.s32.totalorder %s25_s29, 4   ;;  %s1602_s25 = smov %s1311_s26 }
 0x558   : > { %s1603_s26 = smov %s1471_s22  ;;  %s1604_s27 = smov %s1319_s28 }
 0x559   : > { %s1605_s28 = smov %s1607_s20  ;;  %24 = sbr.rel (!%p22_p7) target bundleno = 10 (0xa), region = 125 }
 0x55e   :  { %769 = vsyncpa [#allocation5], 1 }
 0x55f   :  { %771 = vsyncpa [#allocation5 + $0x1], 1 }
 0x560   :  { %772 = vsyncpa [#allocation8], 1 }
 0x561   :  { %773 = vsyncpa [#allocation11], 1 }
 0x562   :  { %774 = vsyncpa [#allocation6], 1 }
 0x563   :  { %776 = vsyncpa [#allocation6 + $0x1], 1 }

</bundles_post_ra>
